<compile_context>
chip_gen: v7x
topology: tpu7x:2x2x1
jax: 0.10.0
libtpu: 0.0.40
codegen_flags: <defaults>
</compile_context>

<pallas_src>
import jax
import jax.numpy as jnp
from jax.experimental import pallas as pl
from jax.experimental.pallas import tpu as pltpu


# ---------------- fused Pallas kernel ----------------

def _fused_rows_kernel(x_ref, ca_ref, cb_ref, o_ref):
    """Row-tile fused forward (batch*height collapsed into the M dimension).

    x_ref : (TILE_M, 16)      flattened input rows (N*H, zero-padded)
    ca_ref: (21, 16)          rows: [ W1e_T (16) | b1e (1) | wrow (2) | brow (2) ]
    cb_ref: (18, 15)          rows: [ W2e_T (16) | ce (2) ]
    o_ref : (2, TILE_M, 15)   even-row (data) outputs for both conv channels
    """
    tile_m = x_ref.shape[0]

    x = x_ref[...]                                                   # (TILE_M,16)
    w1 = ca_ref[0:16, :]                                             # (16,16)
    b1 = ca_ref[16:17, :]                                            # (1,16)

    # l1 (only the 16 live outputs) + ReLU
    v1 = jnp.maximum(
        jnp.dot(x, w1, preferred_element_type=jnp.float32) + b1, 0.0)

    # conv-transpose "hit" values for both output channels + ReLU, stacked
    # along M so the second matmul is a single MXU push.
    d0 = jnp.maximum(v1 * ca_ref[17:18, :] + ca_ref[19:20, :], 0.0)  # (TILE_M,16)
    d1 = jnp.maximum(v1 * ca_ref[18:19, :] + ca_ref[20:21, :], 0.0)  # (TILE_M,16)
    d = jnp.concatenate([d0, d1], axis=0)                            # (2*TILE_M,16)

    w2 = cb_ref[0:16, :]                                             # (16,15)
    t = jnp.dot(d, w2, preferred_element_type=jnp.float32)           # (2*TILE_M,15)

    # l2 bias + folded odd-column constant, then ReLU.  Only the data (even-h)
    # rows are written; the constant odd rows are added in the wrapper.
    o_ref[0, :, :] = jnp.maximum(t[:tile_m, :] + cb_ref[16:17, :], 0.0)
    o_ref[1, :, :] = jnp.maximum(t[tile_m:, :] + cb_ref[17:18, :], 0.0)


# ---------------- one-time parameter preprocessing ----------------

def prepare_params(params):
    """Fold the crop / stride-2 algebra into packed derived parameters (once)."""
    W1, b1 = params["W1"], params["b1"]          # (32, 16), (32,)
    Wt, bt = params["Wt"], params["bt"]          # (1, 2, 1, 1), (2,)
    W2, b2 = params["W2"], params["b2"]          # (15, 32), (15,)

    wt = Wt.reshape(2)                           # per-out-channel scale (k=1, C_in=1)
    cbias = jnp.maximum(bt, 0.0)                 # relu(conv bias): all "miss" positions
    s_odd = W2[:, 1::2].sum(axis=1)              # (15,)  odd (bias-only) columns
    s_all = W2[:, :32].sum(axis=1)               # (15,)  all cropped columns

    # cA: 16-wide constants, packed into one operand.
    cA = jnp.concatenate([
        W1[:16, :].T,                                  # rows  0..15  W1e_T
        b1[:16].reshape(1, 16),                        # row  16      b1e
        jnp.broadcast_to(wt[:, None], (2, 16)),        # rows 17..18  wrow
        jnp.broadcast_to(bt[:, None], (2, 16)),        # rows 19..20  brow
    ], axis=0).astype(jnp.float32)                     # (21, 16)

    # cB: 15-wide constants, packed into one operand.
    ce = cbias[:, None] * s_odd[None, :] + b2[None, :]             # (2, 15)
    cB = jnp.concatenate([W2[:, 0::2].T, ce], axis=0).astype(jnp.float32)  # (18, 15)

    # Fully constant odd-h output rows (never touch the kernel / HBM writeback).
    odd_row = jnp.maximum(cbias[:, None] * s_all[None, :] + b2[None, :], 0.0)  # (2,15)

    return {"cA": cA, "cB": cB, "odd_row": odd_row.astype(jnp.float32)}


# ---------------- forward wrapper ----------------

@jax.jit
def model_forward(x, prep):
    N, Cin, H, F = x.shape
    assert Cin == 1 and F == 16
    Ho = 2 * H - 1
    M = N * H

    # Row tile: up to 512 rows per grid step (v6e/v7x sweet spot), always a
    # multiple of 8 so stores are sublane-dense.
    TILE_M = 512 if M >= 512 else ((M + 7) // 8) * 8
    M_pad = pl.cdiv(M, TILE_M) * TILE_M

    x_flat = x.reshape(M, 16)
    if M_pad != M:
        x_flat = jnp.pad(x_flat, ((0, M_pad - M), (0, 0)))

    out = pl.pallas_call(
        _fused_rows_kernel,
        out_shape=jax.ShapeDtypeStruct((2, M_pad, 15), jnp.float32),
        grid=(M_pad // TILE_M,),
        in_specs=[
            pl.BlockSpec((TILE_M, 16), lambda i: (i, 0)),   # x rows
            pl.BlockSpec((21, 16), lambda i: (0, 0)),       # packed 16-wide consts
            pl.BlockSpec((18, 15), lambda i: (0, 0)),       # packed 15-wide consts
        ],
        out_specs=pl.BlockSpec((2, TILE_M, 15), lambda i: (0, i, 0)),
        compiler_params=pltpu.CompilerParams(
            dimension_semantics=("parallel",)),
    )(x_flat, prep["cA"], prep["cB"])

    # Interleave data (even-h) rows with the precomputed constant odd-h rows and
    # drop the out-of-range last row: (2,M,15) -> (N,2,H,15) -> (N,2,2H-1,15).
    even = out[:, :M, :].reshape(2, N, H, 15).transpose(1, 0, 2, 3)   # (N,2,H,15)
    odd = jnp.broadcast_to(prep["odd_row"][None, :, None, :], (N, 2, H, 15))
    y = jnp.stack([even, odd], axis=3).reshape(N, 2, 2 * H, 15)[:, :, :Ho, :]
    return y


# ---------------- deterministic parameter init (PyTorch-style uniform) -------

def init_params(key):
    ks = jax.random.split(key, 6)

    def u(k, shape, fan_in):
        bound = 1.0 / (fan_in ** 0.5)
        return jax.random.uniform(k, shape, jnp.float32, -bound, bound)

    return {
        "W1": u(ks[0], (32, 16), 16), "b1": u(ks[1], (32,), 16),
        "Wt": u(ks[2], (1, 2, 1, 1), 1), "bt": u(ks[3], (2,), 1),
        "W2": u(ks[4], (15, 32), 32), "b2": u(ks[5], (15,), 32),
    }


# ---------------- pure-JAX reference (unoptimized, for sanity check) ----------

def reference(x, p):
    t1 = x @ p["W1"].T + p["b1"]
    v1 = jnp.maximum(t1, 0.0)                      # (N, 1, H, 32)
    N, _, H, W = v1.shape
    Ho, Wo = 2 * H - 1, 2 * W - 1
    wt = p["Wt"].reshape(2)
    bt = p["bt"]
    t2 = jnp.broadcast_to(bt[None, :, None, None], (N, 2, Ho, Wo))
    hit = v1[:, 0:1] * wt[None, :, None, None] + bt[None, :, None, None]
    t2 = t2.at[:, :, ::2, ::2].set(hit)
    v2 = jnp.maximum(t2, 0.0)
    t3 = v2[..., :32] @ p["W2"].T + p["b2"]
    return jnp.maximum(t3, 0.0)


if __name__ == "__main__":
    key = jax.random.PRNGKey(0)
    pkey, xkey, xkey2 = jax.random.split(key, 3)
    params = init_params(pkey)
    prep = prepare_params(params)          # one-time, outside the hot path

    # (N, C=1, H, feat=16) — small shapes consistent with the module's layers.
    x = jax.random.normal(xkey, (2, 1, 4, 16), jnp.float32)
    y = jax.block_until_ready(model_forward(x, prep))
    y_ref = reference(x, params)
    assert y.shape == (2, 2, 7, 15), y.shape
    assert jnp.allclose(y, y_ref, atol=1e-5, rtol=1e-5), \
        float(jnp.max(jnp.abs(y - y_ref)))

    # Second check exercising multi-tile grid + row padding (M = 640 -> 2 tiles).
    x2 = jax.random.normal(xkey2, (16, 1, 40, 16), jnp.float32)
    y2 = jax.block_until_ready(model_forward(x2, prep))
    y2_ref = reference(x2, params)
    assert y2.shape == (16, 2, 79, 15), y2.shape
    assert jnp.allclose(y2, y2_ref, atol=1e-5, rtol=1e-5), \
        float(jnp.max(jnp.abs(y2 - y2_ref)))

    print("KERNEL_OK")
</pallas_src>

<mosaic_0001>
module attributes {stable_mosaic.version = 11 : i64} {
  func.func @_fused_rows_kernel(%arg0: i32, %arg1: memref<8x16xf32, #tpu.memory_space<vmem>>, %arg2: memref<21x16xf32, #tpu.memory_space<vmem>>, %arg3: memref<18x15xf32, #tpu.memory_space<vmem>>, %arg4: memref<2x8x15xf32, #tpu.memory_space<vmem>>) attributes {dimension_semantics = [#tpu.dimension_semantics<parallel>], iteration_bounds = array<i64: 1>, scalar_prefetch = 0 : i64, scratch_operands = 0 : i64, tpu.core_type = #tpu.core_type<tc>, window_params = [{transform_indices = @transform_0, window_bounds = array<i64: 8, 16>}, {pipeline_mode = #tpu.pipeline_mode<synchronous>, transform_indices = @transform_1, window_bounds = array<i64: 21, 16>}, {pipeline_mode = #tpu.pipeline_mode<synchronous>, transform_indices = @transform_2, window_bounds = array<i64: 18, 15>}, {transform_indices = @transform_3, window_bounds = array<i64: 2, 8, 15>}]} {
    %c0 = arith.constant 0 : index
    %c0_0 = arith.constant 0 : index
    %0 = vector.load %arg1[%c0, %c0_0] : memref<8x16xf32, #tpu.memory_space<vmem>>, vector<8x16xf32>
    %c0_1 = arith.constant 0 : index
    %c0_2 = arith.constant 0 : index
    %1 = vector.load %arg2[%c0_1, %c0_2] : memref<21x16xf32, #tpu.memory_space<vmem>>, vector<16x16xf32>
    %c16 = arith.constant 16 : index
    %c0_3 = arith.constant 0 : index
    %2 = vector.load %arg2[%c16, %c0_3] : memref<21x16xf32, #tpu.memory_space<vmem>>, vector<1x16xf32>
    %cst = arith.constant dense<0.000000e+00> : vector<8x16xf32>
    %3 = tpu.matmul %0, %1, %cst {dimension_numbers = #tpu.dot_dimension_numbers<[1], [0], [0], [1], [0, 0, 1, 1], [], []>} : vector<8x16xf32>, vector<16x16xf32>, vector<8x16xf32> -> vector<8x16xf32>
    %4 = vector.broadcast %2 : vector<1x16xf32> to vector<8x16xf32>
    %5 = arith.addf %3, %4 : vector<8x16xf32>
    %cst_4 = arith.constant 0.000000e+00 : f32
    %6 = vector.broadcast %cst_4 : f32 to vector<8x16xf32>
    %7 = arith.maximumf %5, %6 : vector<8x16xf32>
    %c17 = arith.constant 17 : index
    %c0_5 = arith.constant 0 : index
    %8 = vector.load %arg2[%c17, %c0_5] : memref<21x16xf32, #tpu.memory_space<vmem>>, vector<1x16xf32>
    %9 = vector.broadcast %8 : vector<1x16xf32> to vector<8x16xf32>
    %10 = arith.mulf %7, %9 : vector<8x16xf32>
    %c19 = arith.constant 19 : index
    %c0_6 = arith.constant 0 : index
    %11 = vector.load %arg2[%c19, %c0_6] : memref<21x16xf32, #tpu.memory_space<vmem>>, vector<1x16xf32>
    %12 = vector.broadcast %11 : vector<1x16xf32> to vector<8x16xf32>
    %13 = arith.addf %10, %12 : vector<8x16xf32>
    %cst_7 = arith.constant 0.000000e+00 : f32
    %14 = vector.broadcast %cst_7 : f32 to vector<8x16xf32>
    %15 = arith.maximumf %13, %14 : vector<8x16xf32>
    %c18 = arith.constant 18 : index
    %c0_8 = arith.constant 0 : index
    %16 = vector.load %arg2[%c18, %c0_8] : memref<21x16xf32, #tpu.memory_space<vmem>>, vector<1x16xf32>
    %17 = vector.broadcast %16 : vector<1x16xf32> to vector<8x16xf32>
    %18 = arith.mulf %7, %17 : vector<8x16xf32>
    %c20 = arith.constant 20 : index
    %c0_9 = arith.constant 0 : index
    %19 = vector.load %arg2[%c20, %c0_9] : memref<21x16xf32, #tpu.memory_space<vmem>>, vector<1x16xf32>
    %20 = vector.broadcast %19 : vector<1x16xf32> to vector<8x16xf32>
    %21 = arith.addf %18, %20 : vector<8x16xf32>
    %cst_10 = arith.constant 0.000000e+00 : f32
    %22 = vector.broadcast %cst_10 : f32 to vector<8x16xf32>
    %23 = arith.maximumf %21, %22 : vector<8x16xf32>
    %24 = tpu.concatenate %15, %23 in 0 : vector<8x16xf32>, vector<8x16xf32> -> vector<16x16xf32>
    %c0_11 = arith.constant 0 : index
    %c0_12 = arith.constant 0 : index
    %25 = vector.load %arg3[%c0_11, %c0_12] : memref<18x15xf32, #tpu.memory_space<vmem>>, vector<16x15xf32>
    %cst_13 = arith.constant dense<0.000000e+00> : vector<16x15xf32>
    %26 = tpu.matmul %24, %25, %cst_13 {dimension_numbers = #tpu.dot_dimension_numbers<[1], [0], [0], [1], [0, 0, 1, 1], [], []>} : vector<16x16xf32>, vector<16x15xf32>, vector<16x15xf32> -> vector<16x15xf32>
    %27 = vector.extract_strided_slice %26 {offsets = [0, 0], sizes = [8, 15], strides = [1, 1]} : vector<16x15xf32> to vector<8x15xf32>
    %c16_14 = arith.constant 16 : index
    %c0_15 = arith.constant 0 : index
    %28 = vector.load %arg3[%c16_14, %c0_15] : memref<18x15xf32, #tpu.memory_space<vmem>>, vector<1x15xf32>
    %29 = vector.broadcast %28 : vector<1x15xf32> to vector<8x15xf32>
    %30 = arith.addf %27, %29 : vector<8x15xf32>
    %cst_16 = arith.constant 0.000000e+00 : f32
    %31 = vector.broadcast %cst_16 : f32 to vector<8x15xf32>
    %32 = arith.maximumf %30, %31 : vector<8x15xf32>
    %c0_17 = arith.constant 0 : index
    %c0_18 = arith.constant 0 : index
    %c0_19 = arith.constant 0 : index
    %33 = vector.load %arg4[%c0_17, %c0_18, %c0_19] : memref<2x8x15xf32, #tpu.memory_space<vmem>>, vector<1x8x15xf32>
    %34 = vector.shape_cast %33 : vector<1x8x15xf32> to vector<8x15xf32>
    %35 = vector.shape_cast %32 : vector<8x15xf32> to vector<1x8x15xf32>
    tpu.vector_store %arg4[%c0_17, %c0_18, %c0_19], %35 {strides = array<i32>} : memref<2x8x15xf32, #tpu.memory_space<vmem>>, vector<1x8x15xf32>,
    %36 = vector.extract_strided_slice %26 {offsets = [8, 0], sizes = [8, 15], strides = [1, 1]} : vector<16x15xf32> to vector<8x15xf32>
    %c17_20 = arith.constant 17 : index
    %c0_21 = arith.constant 0 : index
    %37 = vector.load %arg3[%c17_20, %c0_21] : memref<18x15xf32, #tpu.memory_space<vmem>>, vector<1x15xf32>
    %38 = vector.broadcast %37 : vector<1x15xf32> to vector<8x15xf32>
    %39 = arith.addf %36, %38 : vector<8x15xf32>
    %cst_22 = arith.constant 0.000000e+00 : f32
    %40 = vector.broadcast %cst_22 : f32 to vector<8x15xf32>
    %41 = arith.maximumf %39, %40 : vector<8x15xf32>
    %c1 = arith.constant 1 : index
    %c0_23 = arith.constant 0 : index
    %c0_24 = arith.constant 0 : index
    %42 = vector.load %arg4[%c1, %c0_23, %c0_24] : memref<2x8x15xf32, #tpu.memory_space<vmem>>, vector<1x8x15xf32>
    %43 = vector.shape_cast %42 : vector<1x8x15xf32> to vector<8x15xf32>
    %44 = vector.shape_cast %41 : vector<8x15xf32> to vector<1x8x15xf32>
    tpu.vector_store %arg4[%c1, %c0_23, %c0_24], %44 {strides = array<i32>} : memref<2x8x15xf32, #tpu.memory_space<vmem>>, vector<1x8x15xf32>,
    return
  }
  func.func @transform_0(%arg0: i32) -> (i32, i32) {
    %c0_i32 = arith.constant 0 : i32
    %c0_i32_0 = arith.constant 0 : i32
    return %arg0, %c0_i32 : i32, i32
  }
  func.func @transform_1(%arg0: i32) -> (i32, i32) {
    %c0_i32 = arith.constant 0 : i32
    %c0_i32_0 = arith.constant 0 : i32
    %c0_i32_1 = arith.constant 0 : i32
    return %c0_i32, %c0_i32_0 : i32, i32
  }
  func.func @transform_2(%arg0: i32) -> (i32, i32) {
    %c0_i32 = arith.constant 0 : i32
    %c0_i32_0 = arith.constant 0 : i32
    %c0_i32_1 = arith.constant 0 : i32
    return %c0_i32, %c0_i32_0 : i32, i32
  }
  func.func @transform_3(%arg0: i32) -> (i32, i32, i32) {
    %c0_i32 = arith.constant 0 : i32
    %c0_i32_0 = arith.constant 0 : i32
    %c0_i32_1 = arith.constant 0 : i32
    return %c0_i32, %arg0, %c0_i32_0 : i32, i32, i32
  }
}

</mosaic_0001>

<bundles_post_ra>
// kernel: model_forward.1
= control target key start
LH: loop header
LB: loop body
LE: loop exit
PB: predicated region body
PF: predicated region fallthrough
CT: control target
= control target key end

     0   :  { %v270_v0 = vmov 0.0|0.0   ;;  %vm271_vm0 = vmmov 0   ;;  %v272_v3 = vmov 0.0   ;;  %vm22_vm1 = vcmask 130048   ;;  %s338_s1 = inlined_call_operand.vmem [shape: f32[21,16], index: 1, kind: input, shape index: {}]   ;;  %s339_s0 = inlined_call_operand.vmem [shape: f32[8,16], index: 0, kind: input, shape index: {}]   ;;  %s340_s2 = inlined_call_operand.vmem [shape: f32[18,15], index: 2, kind: input, shape index: {}]   ;;  %s341_s3 = inlined_call_operand.vmem [shape: f32[2,8,15], index: 3, kind: output, shape index: {}]  }
   0x1   :  { %260 = vmatprep.subr.bf16.mxu0 %v270_v0  ;;  %v15_v1 = vld [vmem:[%s338_s1] sm:$0xff]  ;;  %v16_v2 = vld [vmem:[%s338_s1 + $0x8] sm:$0xff]  ;;  %250 = vmatprep.mubr.msk.f32.mxu0 %vm271_vm0, %v272_v3  ;;  %v228_v9 = vld [vmem:[%s338_s1 + $0x10] ss:$0 sm:$0xff]  ;;  %vm213_vm2 = vcmask 121856  }
   0x2   :  { %v261_v4 = vpack.c.bf16 %v16_v2, %v15_v1  ;;  %v14_v5 = vld [vmem:[%s339_s0] sm:$0xff]  ;;  %v124_v7 = vld [vmem:[%s340_s2 + $0x8] sm:$0xff]  ;;  %v230_v13 = vld [vmem:[%s338_s1 + $0x11] ss:$0 sm:$0xff] }
   0x3   :  { %v123_v6 = vld [vmem:[%s340_s2] sm:$0xff]  ;;  %v232_v14 = vld [vmem:[%s338_s1 + $0x12] ss:$0 sm:$0xff]  ;;  %v233_v16 = vld [vmem:[%s338_s1 + $0x14] ss:$0 sm:$0xff] }
   0x4   :  { %262 = vmatpush3.bf16.msra.mxu0 %v261_v4  ;;  %v263_v8 = vpack.c.bf16 %v124_v7, %v123_v6  ;;  %v231_v17 = vld [vmem:[%s338_s1 + $0x13] ss:$0 sm:$0xff]  ;;  %v237_v24 = vld [vmem:[%s340_s2 + $0x11] ss:$0 sm:$0xff]  ;;  %v236_v25 = vld [vmem:[%s340_s2 + $0x10] ss:$0 sm:$0xff] }
   0x6   :  { %264 = vmatprep.subr.bf16.mxu1 %v263_v8 }
   0x7   :  { %251 = vmatmul.mubr.msk.f32.vlgmr.msra.gmra.mrb[0].mxu0 %vm22_vm1, %v14_v5  ;;  %266 = vmatpush3.bf16.msra.mxu1 %v263_v8 }
  0xda   :  { %v92_v10 = vpop.f32.mrb[0].mxu0 }
  0xdb   :  { %v93_v11 = vadd.f32 %v228_v9, %v92_v10  ;;  %v252_v12 = vpop.f32.mrb[1].mxu0 }
  0xdd   :  { %v96_v15 = vmax.f32 %v93_v11, 0.0 }
  0xdf   :  { %v102_v18 = vmul.f32 %v230_v13, %v96_v15  ;;  %v115_v19 = vmul.f32 %v232_v14, %v96_v15 }
  0xe1   :  { %v121_v20 = vadd.f32 %v233_v16, %v115_v19  ;;  %v108_v21 = vadd.f32 %v231_v17, %v102_v18 }
  0xe3   :  { %v122_v22 = vmax.f32 %v121_v20, 0.0  ;;  %v109_v23 = vmax.f32 %v108_v21, 0.0 }
  0xe5   :  { %257 = vmatprep.mubr.msk.f32.mxu1 %vm22_vm1, %v109_v23 }
  0xe6   :  { %258 = vmatmul.mubr.msk.f32.vlgmr.msra.gmra.mrb[0].mxu1 %vm22_vm1, %v122_v22 }
 0x1b9   :  { %v259_v26 = vpop.f32.mrb[0].mxu1 }
 0x1ba   :  { %v220_v27 = vadd.f32 %v259_v26, %v237_v24  ;;  %v197_v28 = vpop.f32.mrb[1].mxu1 }
 0x1bb   :  { %v211_v29 = vadd.f32 %v236_v25, %v197_v28 }
 0x1bc   :  { %v221_v30 = vmax.f32 %v220_v27, 0.0 }
 0x1bd   :  { %v212_v31 = vmax.f32 %v211_v29, 0.0 }
 0x1be   :  { %238 = vst.msk [vmem:[%s341_s3 + $0x8] sm:$0xff] %vm213_vm2, %v221_v30 }
 0x1bf   :  { %214 = vst.msk [vmem:[%s341_s3] sm:$0xff] %vm213_vm2, %v212_v31 }

</bundles_post_ra>
